<compile_context>
chip_gen: v5e
topology: v5e:2x2
jax: 0.10.0
libtpu: 0.0.40
codegen_flags: <defaults>
</compile_context>

<pallas_src>
import functools

import jax
import jax.numpy as jnp
from jax import lax
from jax.experimental import pallas as pl
from jax.experimental.pallas import tpu as pltpu


# --------------------------- fused bidirectional LSTM layer --------------------------- #
def _bilstm_layer_kernel(maxlen_ref, x_ref, wihf_ref, wihb_ref, bf_ref, bb_ref,
                         whhf_ref, whhb_ref, len_ref, out_ref,
                         gates_f_ref, gates_b_ref, *, hidden: int):
    """One bidirectional LSTM layer over the sequence for one batch tile.

    maxlen_ref : (n_tiles,)   i32 SMEM   per-tile max valid length (scalar prefetch)
    x_ref      : (T, Bt, Din) bf16       input activations (time-major)
    wihf_ref   : (Din, 4H)    bf16       W_ih_fwd^T
    wihb_ref   : (Din, 4H)    bf16       W_ih_bwd^T
    bf_ref     : (1, 4H)      f32        fused fwd bias (b_ih + b_hh)
    bb_ref     : (1, 4H)      f32        fused bwd bias
    whhf_ref   : (H, 4H)      bf16       W_hh_fwd^T
    whhb_ref   : (H, 4H)      bf16       W_hh_bwd^T
    len_ref    : (Bt, 1)      i32        valid lengths
    out_ref    : (T, Bt, 2H)  bf16       [h_fwd | h_bwd] concatenated on lanes
    gates_*_ref: (T*Bt, 4H)   bf16 VMEM  precomputed input projections (split per dir)
    """
    T, Bt, Din = x_ref.shape
    H = hidden

    # ---- (1) hoisted input projection: two large bf16 GEMMs for all timesteps ----
    x2d = x_ref[...].reshape(T * Bt, Din)                          # bf16, Bt % 8 == 0
    proj_f = jnp.dot(x2d, wihf_ref[...], preferred_element_type=jnp.float32) + bf_ref[...]
    gates_f_ref[...] = proj_f.astype(jnp.bfloat16)                 # (T*Bt, 4H), no reshape
    proj_b = jnp.dot(x2d, wihb_ref[...], preferred_element_type=jnp.float32) + bb_ref[...]
    gates_b_ref[...] = proj_b.astype(jnp.bfloat16)

    lengths = len_ref[...]                                         # (Bt, 1) i32, hoisted
    max_t = jnp.minimum(maxlen_ref[pl.program_id(0)], T)           # SMEM scalar, clamp

    # pad_packed_sequence pads invalid positions with zeros; rows >= max_t never get
    # written by the loop below, so bulk-zero the whole output block once.
    out_ref[...] = jnp.zeros_like(out_ref)

    whh_f = whhf_ref[...]                                          # (H, 4H) bf16, hoisted
    whh_b = whhb_ref[...]

    def gate_math(g, c):
        i = jax.nn.sigmoid(g[:, 0 * H:1 * H])
        f = jax.nn.sigmoid(g[:, 1 * H:2 * H])
        gg = jnp.tanh(g[:, 2 * H:3 * H])
        o = jax.nn.sigmoid(g[:, 3 * H:4 * H])
        c_new = f * c + i * gg
        h_new = o * jnp.tanh(c_new)
        return h_new, c_new

    def step(t, carry):
        h_f, c_f, h_b, c_b = carry
        tb = max_t - 1 - t

        # recurrence: only the small bf16 h @ W_hh^T matmuls remain inside the loop
        rec_f = jnp.dot(h_f.astype(jnp.bfloat16), whh_f, preferred_element_type=jnp.float32)
        rec_b = jnp.dot(h_b.astype(jnp.bfloat16), whh_b, preferred_element_type=jnp.float32)

        row_f = pl.multiple_of(t * Bt, 8)
        row_b = pl.multiple_of(tb * Bt, 8)
        g_f = gates_f_ref[pl.ds(row_f, Bt), :].astype(jnp.float32) + rec_f   # (Bt, 4H)
        g_b = gates_b_ref[pl.ds(row_b, Bt), :].astype(jnp.float32) + rec_b

        hf_new, cf_new = gate_math(g_f, c_f)
        hb_new, cb_new = gate_math(g_b, c_b)

        # packed-sequence masking (boolean selects; backward state stays 0 until
        # tb == length-1, which reproduces the per-sequence backward start).
        mask_f = t < lengths                                       # (Bt, 1) bool
        mask_b = tb < lengths
        h_f = jnp.where(mask_f, hf_new, h_f)
        c_f = jnp.where(mask_f, cf_new, c_f)
        h_b = jnp.where(mask_b, hb_new, h_b)
        c_b = jnp.where(mask_b, cb_new, c_b)

        out_ref[t, :, 0:H] = jnp.where(mask_f, hf_new, 0.0).astype(out_ref.dtype)
        out_ref[tb, :, H:2 * H] = jnp.where(mask_b, hb_new, 0.0).astype(out_ref.dtype)
        return h_f, c_f, h_b, c_b

    z = jnp.zeros((Bt, H), jnp.float32)
    # Dynamic trip count (per-tile max length); lowers to a while loop, no unroll arg.
    lax.fori_loop(0, max_t, step, (z, z, z, z))


def _vmem_budgets():
    """Generation-aware (vmem_limit_bytes, batch-tile budget bytes)."""
    try:
        info = pltpu.get_tpu_info()
        cap = int(getattr(info, "vmem_capacity_bytes", 64 * 1024 * 1024))
    except Exception:
        cap = 64 * 1024 * 1024
    if cap >= 100 * 1024 * 1024:          # v5e / v6e: 128 MiB physical VMEM
        return 96 * 1024 * 1024, 72 * 1024 * 1024
    return 40 * 1024 * 1024, 28 * 1024 * 1024   # v7x: 64 MiB physical VMEM


def _pick_batch_tile(B, T, d_in, hidden, budget_bytes):
    """B is already padded to a multiple of 8 by the wrapper."""
    H = hidden
    # Bt-independent weight/bias footprint (double-buffered worst case, bf16 weights).
    w_bytes = 2 * (2 * d_in * 4 * H * 2 + 2 * H * 4 * H * 2 + 2 * 4 * H * 4 + 4 * B)
    avail = max(budget_bytes - w_bytes, 1)
    # Per batch element (x f32->bf16 x2 buf, out bf16 x2 buf, split bf16 gate scratches,
    # plus one live f32 projection temporary).
    per_b = T * (2 * d_in * 2 + 2 * 2 * H * 2 + 2 * 4 * H * 2 + 4 * H * 4)
    cap = max(8, avail // max(per_b, 1))
    candidates = [c for c in (512, 256, 128, 64, 32, 16, 8) if B % c == 0 and c <= cap]
    # Prefer >= 2 grid tiles (keeps both v7x TensorCores busy, enables HBM pipelining).
    for c in candidates:
        if c <= B // 2:
            return c
    return candidates[0] if candidates else min(B, 8)


def bilstm_layer(x_tbd, tile_max, wih_f, wih_b, b_f, b_b, whhf_t, whhb_t, len2d,
                 *, hidden, b_tile, vmem_limit):
    T, B, Din = x_tbd.shape
    grid = (B // b_tile,)
    kern = functools.partial(_bilstm_layer_kernel, hidden=hidden)
    return pl.pallas_call(
        kern,
        out_shape=jax.ShapeDtypeStruct((T, B, 2 * hidden), jnp.bfloat16),
        grid_spec=pltpu.PrefetchScalarGridSpec(
            num_scalar_prefetch=1,
            grid=grid,
            in_specs=[
                pl.BlockSpec((T, b_tile, Din), lambda b, ml: (0, b, 0)),       # x (batch tile)
                pl.BlockSpec((Din, 4 * hidden), lambda b, ml: (0, 0)),         # W_ih_fwd^T
                pl.BlockSpec((Din, 4 * hidden), lambda b, ml: (0, 0)),         # W_ih_bwd^T
                pl.BlockSpec((1, 4 * hidden), lambda b, ml: (0, 0)),           # bias fwd
                pl.BlockSpec((1, 4 * hidden), lambda b, ml: (0, 0)),           # bias bwd
                pl.BlockSpec((hidden, 4 * hidden), lambda b, ml: (0, 0)),      # W_hh_fwd^T
                pl.BlockSpec((hidden, 4 * hidden), lambda b, ml: (0, 0)),      # W_hh_bwd^T
                pl.BlockSpec((b_tile, 1), lambda b, ml: (b, 0)),               # lengths
            ],
            out_specs=pl.BlockSpec((T, b_tile, 2 * hidden), lambda b, ml: (0, b, 0)),
            scratch_shapes=[pltpu.VMEM((T * b_tile, 4 * hidden), jnp.bfloat16),   # gates fwd
                            pltpu.VMEM((T * b_tile, 4 * hidden), jnp.bfloat16)],  # gates bwd
        ),
        compiler_params=pltpu.CompilerParams(
            dimension_semantics=("parallel",),
            vmem_limit_bytes=vmem_limit),
    )(tile_max, x_tbd, wih_f, wih_b, b_f, b_b, whhf_t, whhb_t, len2d)


# --------------------------------- hidden2label ---------------------------------------- #
def _linear_kernel(x_ref, w_ref, b_ref, o_ref):
    o_ref[...] = jnp.dot(x_ref[...], w_ref[...],
                         preferred_element_type=jnp.float32) + b_ref[...]


def linear(x2d, w_t, b_row, *, vmem_limit):
    # TODO(synk): for maximum overlap this projection could be fused into the last LSTM
    # layer's epilogue (data already resident in VMEM); kept separate but lane-padded.
    N, K = x2d.shape
    Lp = w_t.shape[1]                 # already a multiple of 128 (lane-dense stores)
    row_tile = N
    for cand in (512, 256, 128, 64, 32, 16, 8):
        if N % cand == 0:
            row_tile = cand
            break
    grid = (N // row_tile,)
    return pl.pallas_call(
        _linear_kernel,
        out_shape=jax.ShapeDtypeStruct((N, Lp), jnp.float32),
        grid=grid,
        in_specs=[pl.BlockSpec((row_tile, K), lambda i: (i, 0)),
                  pl.BlockSpec((K, Lp), lambda i: (0, 0)),
                  pl.BlockSpec((1, Lp), lambda i: (0, 0))],
        out_specs=pl.BlockSpec((row_tile, Lp), lambda i: (i, 0)),
        compiler_params=pltpu.CompilerParams(
            dimension_semantics=("parallel",),
            vmem_limit_bytes=vmem_limit),
    )(x2d, w_t, b_row)


# ------------------------------------- params ------------------------------------------ #
def init_params(key, vocab_size, embedding_dim, hidden_dim, num_layers, num_labels):
    H = hidden_dim
    params = {}
    key, k_emb = jax.random.split(key)
    emb = jax.random.normal(k_emb, (vocab_size, embedding_dim), jnp.float32)
    emb = emb.at[0].set(0.0)                       # padding_idx=0 row is zero
    params["embedding"] = emb

    bound = 1.0 / float(H) ** 0.5
    layers = []
    for layer in range(num_layers):
        in_dim = embedding_dim if layer == 0 else 2 * H
        dirs = []
        for _ in range(2):                          # forward, backward
            key, k1, k2, k3, k4 = jax.random.split(key, 5)
            w_ih = jax.random.uniform(k1, (4 * H, in_dim), jnp.float32, -bound, bound)
            w_hh = jax.random.uniform(k2, (4 * H, H), jnp.float32, -bound, bound)
            b_ih = jax.random.uniform(k3, (4 * H,), jnp.float32, -bound, bound)
            b_hh = jax.random.uniform(k4, (4 * H,), jnp.float32, -bound, bound)
            dirs.append((w_ih, w_hh, b_ih, b_hh))
        (wihf, whhf, bif, bhf), (wihb, whhb, bib, bhb) = dirs
        # Pre-transposed, bf16 MXU-ready layouts; biases pre-fused and kept in f32.
        layers.append({
            "wih_f": wihf.T.astype(jnp.bfloat16),          # (in_dim, 4H)
            "wih_b": wihb.T.astype(jnp.bfloat16),          # (in_dim, 4H)
            "b_f": (bif + bhf)[None, :],                   # (1, 4H) f32
            "b_b": (bib + bhb)[None, :],                   # (1, 4H) f32
            "whhf_t": whhf.T.astype(jnp.bfloat16),         # (H, 4H)
            "whhb_t": whhb.T.astype(jnp.bfloat16),         # (H, 4H)
        })
    params["lstm"] = layers

    key, k_w, k_b = jax.random.split(key, 3)
    lin_bound = 1.0 / float(2 * H) ** 0.5
    w = jax.random.uniform(k_w, (num_labels, 2 * H), jnp.float32, -lin_bound, lin_bound)
    b = jax.random.uniform(k_b, (num_labels,), jnp.float32, -lin_bound, lin_bound)
    # Lane-pad labels to a multiple of 128 so the logits store is an unmasked full vst.
    l_pad = ((num_labels + 127) // 128) * 128
    w_p = jnp.zeros((l_pad, 2 * H), jnp.float32).at[:num_labels].set(w)
    b_p = jnp.zeros((l_pad,), jnp.float32).at[:num_labels].set(b)
    params["h2l_wt"] = w_p.T.astype(jnp.bfloat16)   # (2H, Lpad) bf16, pre-transposed
    params["h2l_b"] = b_p[None, :]                  # (1, Lpad) f32
    return params


# ------------------------------------- forward ------------------------------------------ #
def discontinuous_lstm_forward(params, words, lengths, *, hidden_dim, num_layers, num_labels):
    B, T = words.shape
    # Pad batch to a sublane-aligned multiple of 8; padded rows get length 0 (fully masked).
    B_pad = max(8, ((B + 7) // 8) * 8)
    pad = B_pad - B
    words_p = jnp.pad(words, ((0, pad), (0, 0)))                  # pad index 0 -> zero row
    len_p = jnp.pad(lengths.astype(jnp.int32), (0, pad))

    # Embedding lookup (glue gather outside Pallas); activations flow in bf16 from here on.
    emb = params["embedding"][words_p].astype(jnp.bfloat16)       # (B_pad, T, E)
    x = jnp.transpose(emb, (1, 0, 2))                             # time-major (T, B_pad, E)
    len2d = len_p.reshape(-1, 1)                                  # (B_pad, 1) i32

    vmem_limit, tile_budget = _vmem_budgets()

    for layer in range(num_layers):
        p = params["lstm"][layer]
        T_, B_, Din = x.shape
        b_tile = _pick_batch_tile(B_, T_, Din, hidden_dim, tile_budget)
        n_tiles = B_ // b_tile
        # Per-tile max valid length (lengths sorted descending -> later tiles are shorter).
        tile_max = jnp.max(len_p.reshape(n_tiles, b_tile), axis=1).astype(jnp.int32)
        x = bilstm_layer(x, tile_max, p["wih_f"], p["wih_b"], p["b_f"], p["b_b"],
                         p["whhf_t"], p["whhb_t"], len2d,
                         hidden=hidden_dim, b_tile=b_tile, vmem_limit=vmem_limit)

    out = jnp.transpose(x, (1, 0, 2))                             # (B_pad, T, 2H) bf16
    # TODO(synk): nn.Dropout(0.5) is identity in eval mode; training-mode Bernoulli mask omitted.
    N = B_pad * T
    logits_p = linear(out.reshape(N, 2 * hidden_dim), params["h2l_wt"], params["h2l_b"],
                      vmem_limit=vmem_limit)                      # (N, Lpad) f32
    logits = logits_p.reshape(B_pad, T, -1)[:B, :, :num_labels]
    return logits


# --------------------------------------- main -------------------------------------------- #
if __name__ == "__main__":
    VOCAB, EMB, HIDDEN, LAYERS, LABELS = 50, 16, 32, 2, 5
    B, T = 2, 8

    key = jax.random.PRNGKey(0)
    key, k_params, k_words = jax.random.split(key, 3)
    params = init_params(k_params, VOCAB, EMB, HIDDEN, LAYERS, LABELS)

    # enforce_sorted=True -> lengths sorted descending; max length == T
    lengths = jnp.array([8, 5], dtype=jnp.int32)
    words = jax.random.randint(k_words, (B, T), 1, VOCAB, dtype=jnp.int32)
    pos = jnp.arange(T)[None, :]
    words = jnp.where(pos < lengths[:, None], words, 0)           # pad with index 0

    logits = discontinuous_lstm_forward(params, words, lengths,
                                        hidden_dim=HIDDEN, num_layers=LAYERS,
                                        num_labels=LABELS)
    jax.block_until_ready(logits)
    assert logits.shape == (B, T, LABELS)
    assert bool(jnp.all(jnp.isfinite(logits)))
    print("KERNEL_OK")
</pallas_src>

<mosaic_0001>
module attributes {stable_mosaic.version = 11 : i64} {
  func.func @_bilstm_layer_kernel(%arg0: i32, %arg1: memref<1xi32, #tpu.memory_space<smem>>, %arg2: memref<8x8x16xbf16, #tpu.memory_space<vmem>>, %arg3: memref<16x128xbf16, #tpu.memory_space<vmem>>, %arg4: memref<16x128xbf16, #tpu.memory_space<vmem>>, %arg5: memref<1x128xf32, #tpu.memory_space<vmem>>, %arg6: memref<1x128xf32, #tpu.memory_space<vmem>>, %arg7: memref<32x128xbf16, #tpu.memory_space<vmem>>, %arg8: memref<32x128xbf16, #tpu.memory_space<vmem>>, %arg9: memref<8x1xi32, #tpu.memory_space<vmem>>, %arg10: memref<8x8x64xbf16, #tpu.memory_space<vmem>>, %arg11: memref<64x128xbf16, #tpu.memory_space<vmem>>, %arg12: memref<64x128xbf16, #tpu.memory_space<vmem>>) attributes {dimension_semantics = [#tpu.dimension_semantics<parallel>], iteration_bounds = array<i64: 1>, scalar_prefetch = 1 : i64, scratch_operands = 2 : i64, tpu.core_type = #tpu.core_type<tc>, window_params = [{transform_indices = @transform_0, window_bounds = array<i64: 8, 8, 16>}, {pipeline_mode = #tpu.pipeline_mode<synchronous>, transform_indices = @transform_1, window_bounds = array<i64: 16, 128>}, {pipeline_mode = #tpu.pipeline_mode<synchronous>, transform_indices = @transform_2, window_bounds = array<i64: 16, 128>}, {pipeline_mode = #tpu.pipeline_mode<synchronous>, transform_indices = @transform_3, window_bounds = array<i64: 1, 128>}, {pipeline_mode = #tpu.pipeline_mode<synchronous>, transform_indices = @transform_4, window_bounds = array<i64: 1, 128>}, {pipeline_mode = #tpu.pipeline_mode<synchronous>, transform_indices = @transform_5, window_bounds = array<i64: 32, 128>}, {pipeline_mode = #tpu.pipeline_mode<synchronous>, transform_indices = @transform_6, window_bounds = array<i64: 32, 128>}, {transform_indices = @transform_7, window_bounds = array<i64: 8, 1>}, {transform_indices = @transform_8, window_bounds = array<i64: 8, 8, 64>}]} {
    %c0 = arith.constant 0 : index
    %c0_0 = arith.constant 0 : index
    %c0_1 = arith.constant 0 : index
    %0 = vector.load %arg2[%c0, %c0_0, %c0_1] : memref<8x8x16xbf16, #tpu.memory_space<vmem>>, vector<8x8x16xbf16>
    %1 = vector.shape_cast %0 : vector<8x8x16xbf16> to vector<64x16xbf16>
    %c0_2 = arith.constant 0 : index
    %c0_3 = arith.constant 0 : index
    %2 = vector.load %arg3[%c0_2, %c0_3] : memref<16x128xbf16, #tpu.memory_space<vmem>>, vector<16x128xbf16>
    %cst = arith.constant dense<0.000000e+00> : vector<64x128xf32>
    %3 = tpu.matmul %1, %2, %cst {dimension_numbers = #tpu.dot_dimension_numbers<[1], [0], [0], [1], [0, 0, 1, 1], [], []>} : vector<64x16xbf16>, vector<16x128xbf16>, vector<64x128xf32> -> vector<64x128xf32>
    %c0_4 = arith.constant 0 : index
    %c0_5 = arith.constant 0 : index
    %4 = vector.load %arg5[%c0_4, %c0_5] : memref<1x128xf32, #tpu.memory_space<vmem>>, vector<1x128xf32>
    %5 = vector.broadcast %4 : vector<1x128xf32> to vector<64x128xf32>
    %6 = arith.addf %3, %5 : vector<64x128xf32>
    %7 = arith.truncf %6 : vector<64x128xf32> to vector<64x128xbf16>
    %c0_6 = arith.constant 0 : index
    %c0_7 = arith.constant 0 : index
    %8 = vector.load %arg11[%c0_6, %c0_7] : memref<64x128xbf16, #tpu.memory_space<vmem>>, vector<64x128xbf16>
    tpu.vector_store %arg11[%c0_6, %c0_7], %7 {strides = array<i32>} : memref<64x128xbf16, #tpu.memory_space<vmem>>, vector<64x128xbf16>,
    %c0_8 = arith.constant 0 : index
    %c0_9 = arith.constant 0 : index
    %9 = vector.load %arg4[%c0_8, %c0_9] : memref<16x128xbf16, #tpu.memory_space<vmem>>, vector<16x128xbf16>
    %cst_10 = arith.constant dense<0.000000e+00> : vector<64x128xf32>
    %10 = tpu.matmul %1, %9, %cst_10 {dimension_numbers = #tpu.dot_dimension_numbers<[1], [0], [0], [1], [0, 0, 1, 1], [], []>} : vector<64x16xbf16>, vector<16x128xbf16>, vector<64x128xf32> -> vector<64x128xf32>
    %c0_11 = arith.constant 0 : index
    %c0_12 = arith.constant 0 : index
    %11 = vector.load %arg6[%c0_11, %c0_12] : memref<1x128xf32, #tpu.memory_space<vmem>>, vector<1x128xf32>
    %12 = vector.broadcast %11 : vector<1x128xf32> to vector<64x128xf32>
    %13 = arith.addf %10, %12 : vector<64x128xf32>
    %14 = arith.truncf %13 : vector<64x128xf32> to vector<64x128xbf16>
    %c0_13 = arith.constant 0 : index
    %c0_14 = arith.constant 0 : index
    %15 = vector.load %arg12[%c0_13, %c0_14] : memref<64x128xbf16, #tpu.memory_space<vmem>>, vector<64x128xbf16>
    tpu.vector_store %arg12[%c0_13, %c0_14], %14 {strides = array<i32>} : memref<64x128xbf16, #tpu.memory_space<vmem>>, vector<64x128xbf16>,
    %c0_15 = arith.constant 0 : index
    %c0_16 = arith.constant 0 : index
    %16 = vector.load %arg9[%c0_15, %c0_16] : memref<8x1xi32, #tpu.memory_space<vmem>>, vector<8x1xi32>
    %17 = arith.index_cast %arg0 : i32 to index
    %18 = memref.load %arg1[%17] : memref<1xi32, #tpu.memory_space<smem>>
    %c8_i32 = arith.constant 8 : i32
    %19 = arith.minsi %18, %c8_i32 : i32
    %cst_17 = arith.constant 0.000000e+00 : bf16
    %20 = vector.broadcast %cst_17 : bf16 to vector<8x8x64xbf16>
    %c0_18 = arith.constant 0 : index
    %c0_19 = arith.constant 0 : index
    %c0_20 = arith.constant 0 : index
    %21 = vector.load %arg10[%c0_18, %c0_19, %c0_20] : memref<8x8x64xbf16, #tpu.memory_space<vmem>>, vector<8x8x64xbf16>
    tpu.vector_store %arg10[%c0_18, %c0_19, %c0_20], %20 {strides = array<i32>} : memref<8x8x64xbf16, #tpu.memory_space<vmem>>, vector<8x8x64xbf16>,
    %c0_21 = arith.constant 0 : index
    %c0_22 = arith.constant 0 : index
    %22 = vector.load %arg7[%c0_21, %c0_22] : memref<32x128xbf16, #tpu.memory_space<vmem>>, vector<32x128xbf16>
    %c0_23 = arith.constant 0 : index
    %c0_24 = arith.constant 0 : index
    %23 = vector.load %arg8[%c0_23, %c0_24] : memref<32x128xbf16, #tpu.memory_space<vmem>>, vector<32x128xbf16>
    %cst_25 = arith.constant 0.000000e+00 : f32
    %24 = vector.broadcast %cst_25 : f32 to vector<8x32xf32>
    %c0_i32 = arith.constant 0 : i32
    %25 = arith.subi %19, %c0_i32 : i32
    %26 = arith.addi %c0_i32, %25 : i32
    %c1_i32 = arith.constant 1 : i32
    %27:4 = scf.for %arg13 = %c0_i32 to %26 step %c1_i32 iter_args(%arg14 = %24, %arg15 = %24, %arg16 = %24, %arg17 = %24) -> (vector<8x32xf32>, vector<8x32xf32>, vector<8x32xf32>, vector<8x32xf32>)  : i32 {
      %c1_i32_26 = arith.constant 1 : i32
      %28 = arith.subi %19, %c1_i32_26 : i32
      %29 = arith.subi %28, %arg13 : i32
      %30 = arith.truncf %arg14 : vector<8x32xf32> to vector<8x32xbf16>
      %cst_27 = arith.constant dense<0.000000e+00> : vector<8x128xf32>
      %31 = tpu.matmul %30, %22, %cst_27 {dimension_numbers = #tpu.dot_dimension_numbers<[1], [0], [0], [1], [0, 0, 1, 1], [], []>} : vector<8x32xbf16>, vector<32x128xbf16>, vector<8x128xf32> -> vector<8x128xf32>
      %32 = arith.truncf %arg16 : vector<8x32xf32> to vector<8x32xbf16>
      %cst_28 = arith.constant dense<0.000000e+00> : vector<8x128xf32>
      %33 = tpu.matmul %32, %23, %cst_28 {dimension_numbers = #tpu.dot_dimension_numbers<[1], [0], [0], [1], [0, 0, 1, 1], [], []>} : vector<8x32xbf16>, vector<32x128xbf16>, vector<8x128xf32> -> vector<8x128xf32>
      %c8_i32_29 = arith.constant 8 : i32
      %34 = arith.muli %arg13, %c8_i32_29 : i32
      %35 = tpu.assume_multiple %34, 8 : i32
      %c8_i32_30 = arith.constant 8 : i32
      %36 = arith.muli %29, %c8_i32_30 : i32
      %37 = tpu.assume_multiple %36, 8 : i32
      %38 = arith.index_cast %35 : i32 to index
      %c0_31 = arith.constant 0 : index
      %39 = vector.load %arg11[%38, %c0_31] : memref<64x128xbf16, #tpu.memory_space<vmem>>, vector<8x128xbf16>
      %40 = arith.extf %39 : vector<8x128xbf16> to vector<8x128xf32>
      %41 = arith.addf %40, %31 : vector<8x128xf32>
      %42 = arith.index_cast %37 : i32 to index
      %c0_32 = arith.constant 0 : index
      %43 = vector.load %arg12[%42, %c0_32] : memref<64x128xbf16, #tpu.memory_space<vmem>>, vector<8x128xbf16>
      %44 = arith.extf %43 : vector<8x128xbf16> to vector<8x128xf32>
      %45 = arith.addf %44, %33 : vector<8x128xf32>
      %46 = vector.extract_strided_slice %41 {offsets = [0, 0], sizes = [8, 32], strides = [1, 1]} : vector<8x128xf32> to vector<8x32xf32>
      %47 = arith.negf %46 : vector<8x32xf32>
      %48 = math.exp %47 : vector<8x32xf32>
      %cst_33 = arith.constant 1.000000e+00 : f32
      %49 = vector.broadcast %cst_33 : f32 to vector<8x32xf32>
      %50 = arith.addf %49, %48 : vector<8x32xf32>
      %51 = arith.divf %49, %50 : vector<8x32xf32>
      %52 = vector.extract_strided_slice %41 {offsets = [0, 32], sizes = [8, 32], strides = [1, 1]} : vector<8x128xf32> to vector<8x32xf32>
      %53 = arith.negf %52 : vector<8x32xf32>
      %54 = math.exp %53 : vector<8x32xf32>
      %cst_34 = arith.constant 1.000000e+00 : f32
      %55 = vector.broadcast %cst_34 : f32 to vector<8x32xf32>
      %56 = arith.addf %55, %54 : vector<8x32xf32>
      %57 = arith.divf %55, %56 : vector<8x32xf32>
      %58 = vector.extract_strided_slice %41 {offsets = [0, 64], sizes = [8, 32], strides = [1, 1]} : vector<8x128xf32> to vector<8x32xf32>
      %59 = math.tanh %58 : vector<8x32xf32>
      %60 = vector.extract_strided_slice %41 {offsets = [0, 96], sizes = [8, 32], strides = [1, 1]} : vector<8x128xf32> to vector<8x32xf32>
      %61 = arith.negf %60 : vector<8x32xf32>
      %62 = math.exp %61 : vector<8x32xf32>
      %cst_35 = arith.constant 1.000000e+00 : f32
      %63 = vector.broadcast %cst_35 : f32 to vector<8x32xf32>
      %64 = arith.addf %63, %62 : vector<8x32xf32>
      %65 = arith.divf %63, %64 : vector<8x32xf32>
      %66 = arith.mulf %57, %arg15 : vector<8x32xf32>
      %67 = arith.mulf %51, %59 : vector<8x32xf32>
      %68 = arith.addf %66, %67 : vector<8x32xf32>
      %69 = math.tanh %68 : vector<8x32xf32>
      %70 = arith.mulf %65, %69 : vector<8x32xf32>
      %71 = vector.extract_strided_slice %45 {offsets = [0, 0], sizes = [8, 32], strides = [1, 1]} : vector<8x128xf32> to vector<8x32xf32>
      %72 = arith.negf %71 : vector<8x32xf32>
      %73 = math.exp %72 : vector<8x32xf32>
      %cst_36 = arith.constant 1.000000e+00 : f32
      %74 = vector.broadcast %cst_36 : f32 to vector<8x32xf32>
      %75 = arith.addf %74, %73 : vector<8x32xf32>
      %76 = arith.divf %74, %75 : vector<8x32xf32>
      %77 = vector.extract_strided_slice %45 {offsets = [0, 32], sizes = [8, 32], strides = [1, 1]} : vector<8x128xf32> to vector<8x32xf32>
      %78 = arith.negf %77 : vector<8x32xf32>
      %79 = math.exp %78 : vector<8x32xf32>
      %cst_37 = arith.constant 1.000000e+00 : f32
      %80 = vector.broadcast %cst_37 : f32 to vector<8x32xf32>
      %81 = arith.addf %80, %79 : vector<8x32xf32>
      %82 = arith.divf %80, %81 : vector<8x32xf32>
      %83 = vector.extract_strided_slice %45 {offsets = [0, 64], sizes = [8, 32], strides = [1, 1]} : vector<8x128xf32> to vector<8x32xf32>
      %84 = math.tanh %83 : vector<8x32xf32>
      %85 = vector.extract_strided_slice %45 {offsets = [0, 96], sizes = [8, 32], strides = [1, 1]} : vector<8x128xf32> to vector<8x32xf32>
      %86 = arith.negf %85 : vector<8x32xf32>
      %87 = math.exp %86 : vector<8x32xf32>
      %cst_38 = arith.constant 1.000000e+00 : f32
      %88 = vector.broadcast %cst_38 : f32 to vector<8x32xf32>
      %89 = arith.addf %88, %87 : vector<8x32xf32>
      %90 = arith.divf %88, %89 : vector<8x32xf32>
      %91 = arith.mulf %82, %arg17 : vector<8x32xf32>
      %92 = arith.mulf %76, %84 : vector<8x32xf32>
      %93 = arith.addf %91, %92 : vector<8x32xf32>
      %94 = math.tanh %93 : vector<8x32xf32>
      %95 = arith.mulf %90, %94 : vector<8x32xf32>
      %96 = vector.broadcast %arg13 : i32 to vector<8x1xi32>
      %97 = arith.cmpi slt, %96, %16 : vector<8x1xi32>
      %98 = vector.broadcast %29 : i32 to vector<8x1xi32>
      %99 = arith.cmpi slt, %98, %16 : vector<8x1xi32>
      %100 = vector.shape_cast %97 : vector<8x1xi1> to vector<8x1xi1>
      %101 = vector.broadcast %100 : vector<8x1xi1> to vector<8x32xi1>
      %102 = arith.select %101, %70, %arg14 : vector<8x32xi1>, vector<8x32xf32>
      %103 = vector.shape_cast %97 : vector<8x1xi1> to vector<8x1xi1>
      %104 = vector.broadcast %103 : vector<8x1xi1> to vector<8x32xi1>
      %105 = arith.select %104, %68, %arg15 : vector<8x32xi1>, vector<8x32xf32>
      %106 = vector.shape_cast %99 : vector<8x1xi1> to vector<8x1xi1>
      %107 = vector.broadcast %106 : vector<8x1xi1> to vector<8x32xi1>
      %108 = arith.select %107, %95, %arg16 : vector<8x32xi1>, vector<8x32xf32>
      %109 = vector.shape_cast %99 : vector<8x1xi1> to vector<8x1xi1>
      %110 = vector.broadcast %109 : vector<8x1xi1> to vector<8x32xi1>
      %111 = arith.select %110, %93, %arg17 : vector<8x32xi1>, vector<8x32xf32>
      %cst_39 = arith.constant 0.000000e+00 : f32
      %112 = vector.shape_cast %97 : vector<8x1xi1> to vector<8x1xi1>
      %113 = vector.broadcast %112 : vector<8x1xi1> to vector<8x32xi1>
      %114 = vector.broadcast %cst_39 : f32 to vector<8x32xf32>
      %115 = arith.select %113, %70, %114 : vector<8x32xi1>, vector<8x32xf32>
      %116 = arith.truncf %115 : vector<8x32xf32> to vector<8x32xbf16>
      %117 = arith.index_cast %arg13 : i32 to index
      %c0_40 = arith.constant 0 : index
      %c0_41 = arith.constant 0 : index
      %118 = vector.load %arg10[%117, %c0_40, %c0_41] : memref<8x8x64xbf16, #tpu.memory_space<vmem>>, vector<1x8x32xbf16>
      %119 = vector.shape_cast %118 : vector<1x8x32xbf16> to vector<8x32xbf16>
      %120 = vector.shape_cast %116 : vector<8x32xbf16> to vector<1x8x32xbf16>
      tpu.vector_store %arg10[%117, %c0_40, %c0_41], %120 {strides = array<i32>} : memref<8x8x64xbf16, #tpu.memory_space<vmem>>, vector<1x8x32xbf16>,
      %cst_42 = arith.constant 0.000000e+00 : f32
      %121 = vector.shape_cast %99 : vector<8x1xi1> to vector<8x1xi1>
      %122 = vector.broadcast %121 : vector<8x1xi1> to vector<8x32xi1>
      %123 = vector.broadcast %cst_42 : f32 to vector<8x32xf32>
      %124 = arith.select %122, %95, %123 : vector<8x32xi1>, vector<8x32xf32>
      %125 = arith.truncf %124 : vector<8x32xf32> to vector<8x32xbf16>
      %126 = arith.index_cast %29 : i32 to index
      %c0_43 = arith.constant 0 : index
      %c32 = arith.constant 32 : index
      %127 = vector.load %arg10[%126, %c0_43, %c32] : memref<8x8x64xbf16, #tpu.memory_space<vmem>>, vector<1x8x32xbf16>
      %128 = vector.shape_cast %127 : vector<1x8x32xbf16> to vector<8x32xbf16>
      %129 = vector.shape_cast %125 : vector<8x32xbf16> to vector<1x8x32xbf16>
      tpu.vector_store %arg10[%126, %c0_43, %c32], %129 {strides = array<i32>} : memref<8x8x64xbf16, #tpu.memory_space<vmem>>, vector<1x8x32xbf16>,
      scf.yield %102, %105, %108, %111 : vector<8x32xf32>, vector<8x32xf32>, vector<8x32xf32>, vector<8x32xf32>
    }
    return
  }
  func.func @transform_0(%arg0: i32, %arg1: memref<1xi32, #tpu.memory_space<smem>>) -> (i32, i32, i32) {
    %c0_i32 = arith.constant 0 : i32
    %c0_i32_0 = arith.constant 0 : i32
    %c0_i32_1 = arith.constant 0 : i32
    return %c0_i32, %arg0, %c0_i32_0 : i32, i32, i32
  }
  func.func @transform_1(%arg0: i32, %arg1: memref<1xi32, #tpu.memory_space<smem>>) -> (i32, i32) {
    %c0_i32 = arith.constant 0 : i32
    %c0_i32_0 = arith.constant 0 : i32
    %c0_i32_1 = arith.constant 0 : i32
    return %c0_i32, %c0_i32_0 : i32, i32
  }
  func.func @transform_2(%arg0: i32, %arg1: memref<1xi32, #tpu.memory_space<smem>>) -> (i32, i32) {
    %c0_i32 = arith.constant 0 : i32
    %c0_i32_0 = arith.constant 0 : i32
    %c0_i32_1 = arith.constant 0 : i32
    return %c0_i32, %c0_i32_0 : i32, i32
  }
  func.func @transform_3(%arg0: i32, %arg1: memref<1xi32, #tpu.memory_space<smem>>) -> (i32, i32) {
    %c0_i32 = arith.constant 0 : i32
    %c0_i32_0 = arith.constant 0 : i32
    %c0_i32_1 = arith.constant 0 : i32
    return %c0_i32, %c0_i32_0 : i32, i32
  }
  func.func @transform_4(%arg0: i32, %arg1: memref<1xi32, #tpu.memory_space<smem>>) -> (i32, i32) {
    %c0_i32 = arith.constant 0 : i32
    %c0_i32_0 = arith.constant 0 : i32
    %c0_i32_1 = arith.constant 0 : i32
    return %c0_i32, %c0_i32_0 : i32, i32
  }
  func.func @transform_5(%arg0: i32, %arg1: memref<1xi32, #tpu.memory_space<smem>>) -> (i32, i32) {
    %c0_i32 = arith.constant 0 : i32
    %c0_i32_0 = arith.constant 0 : i32
    %c0_i32_1 = arith.constant 0 : i32
    return %c0_i32, %c0_i32_0 : i32, i32
  }
  func.func @transform_6(%arg0: i32, %arg1: memref<1xi32, #tpu.memory_space<smem>>) -> (i32, i32) {
    %c0_i32 = arith.constant 0 : i32
    %c0_i32_0 = arith.constant 0 : i32
    %c0_i32_1 = arith.constant 0 : i32
    return %c0_i32, %c0_i32_0 : i32, i32
  }
  func.func @transform_7(%arg0: i32, %arg1: memref<1xi32, #tpu.memory_space<smem>>) -> (i32, i32) {
    %c0_i32 = arith.constant 0 : i32
    %c0_i32_0 = arith.constant 0 : i32
    return %arg0, %c0_i32 : i32, i32
  }
  func.func @transform_8(%arg0: i32, %arg1: memref<1xi32, #tpu.memory_space<smem>>) -> (i32, i32, i32) {
    %c0_i32 = arith.constant 0 : i32
    %c0_i32_0 = arith.constant 0 : i32
    %c0_i32_1 = arith.constant 0 : i32
    return %c0_i32, %arg0, %c0_i32_0 : i32, i32, i32
  }
}

</mosaic_0001>

<bundles_post_ra>
// kernel: tpu_custom_call.1
= control target key start
LH: loop header
LB: loop body
LE: loop exit
PB: predicated region body
PF: predicated region fallthrough
CT: control target
= control target key end

     0   :  { %15 = vsyncpa [#allocation7], 0  ;;  %s1092_s0 = inlined_call_operand.<no memory space> [shape: s32[1], index: 0, kind: input, shape index: {}]   ;;  %s1093_s1 = inlined_call_operand.hbm [shape: bf16[8,8,16], index: 1, kind: input, shape index: {}]   ;;  %s1094_s2 = inlined_call_operand.vmem [shape: bf16[16,128], index: 2, kind: input, shape index: {}]   ;;  %s1095_s3 = inlined_call_operand.hbm [shape: bf16[16,128], index: 3, kind: input, shape index: {}]   ;;  %s1096_s4 = inlined_call_operand.vmem [shape: f32[1,128], index: 4, kind: input, shape index: {}]   ;;  %s1097_s5 = inlined_call_operand.vmem [shape: f32[1,128], index: 5, kind: input, shape index: {}]   ;;  %s1098_s6 = inlined_call_operand.hbm [shape: bf16[32,128], index: 6, kind: input, shape index: {}]   ;;  %s1099_s7 = inlined_call_operand.hbm [shape: bf16[32,128], index: 7, kind: input, shape index: {}]   ;;  %s1100_s8 = inlined_call_operand.vmem [shape: s32[8,1], index: 8, kind: input, shape index: {}]   ;;  %s1101_s9 = inlined_call_operand.hbm [shape: bf16[8,8,64], index: 9, kind: output, shape index: {}]  }
   0x1   :  { %16 = vsyncpa [#allocation10], 0 }
   0x2   :  { %17 = vsyncpa [#allocation13], 0 }
   0x3   :  { %18 = vsyncpa [#allocation8], 0  ;;  %s38_s11 = sshll.u32 %s1095_s3, 4  ;;  %s883_s12 = smov [#allocation9]   ;;  %s39_s11 = int_to_ptr.hbm [resolvable:$true] %s38_s11 }
   0x4   :  { %s40_s13 = sshll.u32 %s883_s12, 4  ;;  %s23_s16 = sshll.u32 %s1093_s1, 4  ;;  %s41_s13 = int_to_ptr.vmem [resolvable:$true] %s40_s13  ;;  %s24_s16 = int_to_ptr.hbm [resolvable:$true] %s23_s16 }
   0x5   :  { %s884_s17 = smov 64   ;;  %s885_s18 = smov 4  }
   0x6   :  { %46 = dma.hbm_to_vmem [thread:$0]  %s39_s11, 128, %s41_s13, [#allocation10], %s884_s17, %s884_s17, %s885_s18  }
   0x7   :  { %s886_s19 = smov [#allocation6]   ;;  %s55_s3 = sshll.u32 %s1098_s6, 4  ;;  %s56_s3 = int_to_ptr.hbm [resolvable:$true] %s55_s3 }
   0x8   :  { %s25_s20 = sshll.u32 %s886_s19, 4  ;;  %s68_s24 = sshll.u32 %s1099_s7, 4  ;;  %s26_s20 = int_to_ptr.vmem [resolvable:$true] %s25_s20  ;;  %s69_s24 = int_to_ptr.hbm [resolvable:$true] %s68_s24 }
   0x9   :  { %31 = dma.hbm_to_vmem [thread:$0]  %s24_s16, 512, %s26_s20, [#allocation7], %s884_s17, %s884_s17, %s885_s18  }
   0xa   :  { %s887_s25 = smov [#allocation11]   ;;  %s888_s27 = smov [#allocation12]  }
   0xb   :  { %s57_s26 = sshll.u32 %s887_s25, 4  ;;  %s70_s6 = sshll.u32 %s888_s27, 4  ;;  %s58_s26 = int_to_ptr.vmem [resolvable:$true] %s57_s26  ;;  %s71_s6 = int_to_ptr.vmem [resolvable:$true] %s70_s6 }
   0xc   :  { %63 = dma.hbm_to_vmem [thread:$0]  %s56_s3, 256, %s58_s26, [#allocation10], %s884_s17, %s884_s17, %s885_s18  }
   0xd   :  { %76 = dma.hbm_to_vmem [thread:$0]  %s69_s24, 256, %s71_s6, [#allocation13], %s884_s17, %s884_s17, %s885_s18  }
   0xe   :  { %855 = dma.done.wait [#allocation7], 512  }
   0xf   :  { %856 = vsyncadd [#allocation7], 4294966784 }
  0x10   :  { %857 = dma.done.wait [#allocation10], 384  }
  0x11   :  { %858 = vsyncadd [#allocation10], 4294966912 }
  0x12   :  { %859 = dma.done.wait [#allocation13], 256  }
  0x13   :  { %860 = vsyncadd [#allocation13], 4294967040  ;;  %vm255_vm0 = vcmask 519168   ;;  %v889_v0 = vmov 0   ;;  %v971_v1 = vld [vmem:[%s1100_s8] sm:$0xff]  ;;  %vm136_vm1 = vcmask 130048  }
  0x14   :  { %256 = vst.msk [vmem:[#allocation14] sm:$0xf] %vm255_vm0, %v889_v0  ;;  %v973_v2 = vld [vmem:[#allocation11] sm:$0xf]  ;;  %v587_v3 = vld [vmem:[%s1094_s2] sm:$0xff]  ;;  %v585_v13 = vld [vmem:[#allocation6 + $0x10] sm:$0xff] }
  0x15   :  { %257 = vst.msk [vmem:[#allocation14 + $0x4] sm:$0xf] %vm255_vm0, %v889_v0  ;;  %v978_v4 = vld [vmem:[#allocation11] sm:$0xf0]  ;;  %v980_v5 = vld [vmem:[#allocation11 + $0x8] sm:$0xf]  ;;  %156 = vmatpush.bf16.msra.mxu0 %v587_v3  ;;  %642 = vmatpush.bf16.msra.mxu2 %v587_v3 }
  0x16   :  { %258 = vst.msk [vmem:[#allocation14 + $0x8] sm:$0xf] %vm255_vm0, %v889_v0  ;;  %v982_v6 = vld [vmem:[#allocation11 + $0x8] sm:$0xf0]  ;;  %v984_v7 = vld [vmem:[#allocation12] sm:$0xf] }
  0x17   :  { %259 = vst.msk [vmem:[#allocation14 + $0xc] sm:$0xf] %vm255_vm0, %v889_v0  ;;  %v986_v8 = vld [vmem:[#allocation12] sm:$0xf0]  ;;  %v988_v9 = vld [vmem:[#allocation12 + $0x8] sm:$0xf] }
  0x18   :  { %260 = vst.msk [vmem:[#allocation14 + $0x10] sm:$0xf] %vm255_vm0, %v889_v0  ;;  %v990_v10 = vld [vmem:[#allocation12 + $0x8] sm:$0xf0]  ;;  %545 = vmatmul.msk.bf16.vlgmr.msra.gmra.mxu2 %vm136_vm1, %v585_v13  ;;  %v584_v14 = vld [vmem:[#allocation6 + $0x8] sm:$0xff]  ;;  %v586_v15 = vld [vmem:[#allocation6 + $0x18] sm:$0xff] }
  0x19   :  { %261 = vst.msk [vmem:[#allocation14 + $0x14] sm:$0xf] %vm255_vm0, %v889_v0  ;;  %v588_v11 = vld [vmem:[#allocation9] sm:$0xff]  ;;  %p253_p0 = scmp.lt.s32.totalorder %s1092_s0, 8  ;;  %p593_p1 = scmp.le.s32.totalorder %s1092_s0, 0 }
  0x1a   :  { %262 = vst.msk [vmem:[#allocation14 + $0x18] sm:$0xf] %vm255_vm0, %v889_v0  ;;  %v583_v12 = vld [vmem:[#allocation6] sm:$0xff]  ;;  %213 = vmatpush.bf16.msra.mxu1 %v588_v11  ;;  %643 = vmatpush.bf16.msra.mxu3 %v588_v11  ;;  %s1017_s19 = smov (!%p593_p1), 0  }
  0x1b   :  { %263 = vst.msk [vmem:[#allocation14 + $0x1c] sm:$0xf] %vm255_vm0, %v889_v0  ;;  %543 = vmatmul.msk.bf16.vlgmr.msra.gmra.mxu0 %vm136_vm1, %v583_v12  ;;  %s998_s12 = scalar_select %p253_p0, %s1092_s0, 8  ;;  %v695_v18 = vld [vmem:[%s1096_s4] ss:$0 sm:$0xff] }
  0x1c   :  { %v696_v20 = vld [vmem:[%s1097_s5] ss:$0 sm:$0xff] }
  0x1d   :  { %551 = vmatmul.msk.bf16.vlgmr.msra.gmra.mxu1 %vm136_vm1, %v583_v12  ;;  %553 = vmatmul.msk.bf16.vlgmr.msra.gmra.mxu3 %vm136_vm1, %v585_v13 }
  0x28   :  { %546 = vmatmul.msk.bf16.gmra.mxu2 %vm136_vm1, %v586_v15 }
  0x2b   :  { %544 = vmatmul.msk.bf16.gmra.mxu0 %vm136_vm1, %v584_v14 }
  0x2d   :  { %552 = vmatmul.msk.bf16.gmra.mxu1 %vm136_vm1, %v584_v14  ;;  %554 = vmatmul.msk.bf16.gmra.mxu3 %vm136_vm1, %v586_v15 }
  0x98   :  { %v158_v16 = vpop.f32.mrf.mxu0 }
  0x99   :  { %v159_v23 = vadd.f32 %v695_v18, %v158_v16 }
  0x9a   :  { %v215_v17 = vpop.f32.mrf.mxu1 }
  0x9b   :  { %v168_v19 = vpop.f32.mrf.mxu2  ;;  %v216_v26 = vadd.f32 %v696_v20, %v215_v17 }
  0x9c   :  { %v169_v31 = vadd.f32 %v695_v18, %v168_v19 }
  0xa0   :  { %v225_v21 = vpop.f32.mrf.mxu3  ;;  %v160_v22 = vpop.f32.mrf.mxu0 }
  0xa1   :  { %v161_v24 = vadd.f32 %v695_v18, %v160_v22  ;;  %v226_v35 = vadd.f32 %v696_v20, %v225_v21 }
  0xa2   :  { %v217_v25 = vpop.f32.mrf.mxu1 }
  0xa3   :  { %v599_v27 = vpack.c.bf16 %v161_v24, %v159_v23  ;;  %v218_v28 = vadd.f32 %v696_v20, %v217_v25  ;;  %v170_v30 = vpop.f32.mrf.mxu2 }
  0xa4   :  { %v171_v32 = vadd.f32 %v695_v18, %v170_v30 }
  0xa5   :  { %600 = vst [vmem:[#allocation2] sm:$0xff] %v599_v27   ;;  %v619_v29 = vpack.c.bf16 %v218_v28, %v216_v26 }
  0xa6   :  { %v609_v36 = vpack.c.bf16 %v171_v32, %v169_v31 }
  0xa7   :  { %620 = vst [vmem:[#allocation3] sm:$0xff] %v619_v29  }
  0xa8   :  { %v227_v33 = vpop.f32.mrf.mxu3  ;;  %v163_v34 = vpop.f32.mrf.mxu0  ;;  %637 = vst [vmem:[#allocation2 + $0x10] sm:$0xff] %v609_v36  }
  0xa9   :  { %v228_v37 = vadd.f32 %v696_v20, %v227_v33  ;;  %v164_v43 = vadd.f32 %v695_v18, %v163_v34 }
  0xaa   :  { %v220_v38 = vpop.f32.mrf.mxu1 }
  0xab   :  { %v629_v39 = vpack.c.bf16 %v228_v37, %v226_v35  ;;  %v173_v40 = vpop.f32.mrf.mxu2  ;;  %v221_v46 = vadd.f32 %v696_v20, %v220_v38 }
  0xac   :  { %v174_v51 = vadd.f32 %v695_v18, %v173_v40 }
  0xad   :  { %640 = vst [vmem:[#allocation3 + $0x10] sm:$0xff] %v629_v39  }
  0xb0   :  { %v230_v41 = vpop.f32.mrf.mxu3  ;;  %v165_v42 = vpop.f32.mrf.mxu0 }
  0xb1   :  { %v166_v44 = vadd.f32 %v695_v18, %v165_v42  ;;  %v231_v54 = vadd.f32 %v696_v20, %v230_v41 }
  0xb2   :  { %v222_v45 = vpop.f32.mrf.mxu1 }
  0xb3   :  { %v604_v47 = vpack.c.bf16 %v166_v44, %v164_v43  ;;  %v223_v48 = vadd.f32 %v696_v20, %v222_v45  ;;  %v175_v50 = vpop.f32.mrf.mxu2 }
  0xb4   :  { %v176_v52 = vadd.f32 %v695_v18, %v175_v50 }
  0xb5   :  { %636 = vst [vmem:[#allocation2 + $0x8] sm:$0xff] %v604_v47   ;;  %v624_v49 = vpack.c.bf16 %v223_v48, %v221_v46 }
  0xb6   :  { %v614_v55 = vpack.c.bf16 %v176_v52, %v174_v51 }
  0xb7   :  { %639 = vst [vmem:[#allocation3 + $0x8] sm:$0xff] %v624_v49  }
  0xb8   :  { %v232_v53 = vpop.f32.mrf.mxu3  ;;  %638 = vst [vmem:[#allocation2 + $0x18] sm:$0xff] %v614_v55  }
  0xb9   :  { %v233_v56 = vadd.f32 %v696_v20, %v232_v53  ;;  %512 = sbr.rel (%p593_p1) target bundleno = 897 (0x381), region = 73 }
  0xbb   :  { %v634_v57 = vpack.c.bf16 %v233_v56, %v231_v54 }
  0xbd   :  { %641 = vst [vmem:[#allocation3 + $0x18] sm:$0xff] %v634_v57  }
  0xbe   :  { %v1009_v58 = vmov 0.0   ;;  %v1011_v59 = vmov 0.0   ;;  %v1013_v60 = vmov 0.0   ;;  %v1015_v61 = vmov 0.0  }
  0xbf LB: > { %v564_v62 = vor.u32 %v982_v6, %v980_v5  ;;  %v284_v63 = vpack.c.bf16 %v877_v61, %v877_v61  ;;  %v560_v0 = vor.u32 %v978_v4, %v973_v2  ;;  %s890_s0 = smov 32   ;;  %v317_v3 = vpack.c.bf16 %v869_v59, %v869_v59  ;;  %s575_s20 = sshll.u32 %s881_s19, 3  ;;  %s881_s19 = sphi %s1017_s19, %s275_s19   ;;  %v877_v61 = vphi %v1015_v61, %v448_v61   ;;  %v873_v60 = vphi %v1013_v60, %v449_v60   ;;  %v869_v59 = vphi %v1011_v59, %v455_v59   ;;  %v865_v58 = vphi %v1009_v58, %v456_v58  }
  0xc0   : > { %v573_v11 = vor.u32 %v990_v10, %v988_v9  ;;  %v569_v12 = vor.u32 %v986_v8, %v984_v7  ;;  %vm300_vm2 = vcmask 261120   ;;  %s556_s21 = sadd.s32 4294967295, %s998_s12  ;;  %s351_s22 = sshra.s32 %s575_s20, 3  ;;  %v892_v34 = vmov 0  }
  0xc1   : > { %310 = vmatpush.bf16.msra.mxu0 %v564_v62  ;;  %286 = vrot.lane.b32.xlu0 %v284_v63, %s890_s0  ;;  %s1051_s3 = ssub.s32 %s556_s21, %s881_s19  ;;  %s577_s1 = sshll.u32 %s351_s22, 2  ;;  %v439_v62 = vstv %s881_s19  ;;  %vm465_vm15 = vcmask 257024   ;;  %vm475_vm0 = vcmask 519424  }
  0xc2   : > { %342 = vmatpush.bf16.msra.mxu1 %v573_v11  ;;  %s576_s23 = sshll.u32 %s1051_s3, 3  ;;  %s354_s25 = scalar_lea.vmem [#allocation2], %s577_s1  ;;  %697 = vset.pattern.permute.xlu2 %v892_v34  ;;  %vm440_vm11 = vcmp.lt.s32.totalorder %v439_v62, %v971_v1 }
  0xc3   : > { %s358_s24 = sshra.s32 %s576_s23, 3  ;;  %v355_v15 = vld [vmem:[%s354_s25] sm:$0xf]  ;;  %s891_s6 = smov 64   ;;  %698 = vset.pattern.permute.xlu0 %v892_v34  ;;  %v443_v63 = vsel %vm440_vm11, 1, %v892_v34 }
  0xc4   : > { %s578_s26 = sshll.u32 %s358_s24, 2  ;;  %v356_v16 = vunpack.c.l.bf16 %v355_v15  ;;  %s581_s7 = sshll.u32 %s881_s19, 2 }
  0xc5   : > { %311 = vmatpush.bf16.msra.mxu0 %v560_v0  ;;  %s361_s27 = scalar_lea.vmem [#allocation3], %s578_s26  ;;  %s582_s28 = sshll.u32 %s1051_s3, 2 }
  0xc6   : > { %343 = vmatpush.bf16.msra.mxu1 %v569_v12  ;;  %v362_v19 = vld [vmem:[%s361_s27] sm:$0xf]  ;;  %s464_s29 = scalar_lea.vmem [#allocation14], %s581_s7  ;;  %s474_s30 = scalar_lea.vmem [#allocation14], %s582_s28 }
  0xc7   : > { %v363_v20 = vunpack.c.l.bf16 %v362_v19  ;;  %s275_s19 = sadd.s32 1, %s881_s19  }
  0xc8   : > { %p274_p2 = scmp.ge.s32.totalorder %s275_s19, %s998_s12 }
  0xc9   : > { %319 = vrot.lane.b32.xlu0 %v317_v3, %s890_s0 }
 0x133   : > { %v287_v13 = vpop.permute.xlu0 %286 }
 0x134   : > { %565 = vmatmul.msk.bf16.vlgmr.msra.gmra.mxu0 %vm300_vm2, %v287_v13 }
 0x13b   : > { %v320_v14 = vpop.permute.xlu0 %319 }
 0x13c   : > { %574 = vmatmul.msk.bf16.vlgmr.msra.gmra.mxu1 %vm300_vm2, %v320_v14 }
 0x1b1   : > { %v313_v17 = vpop.f32.mrf.mxu0 }
 0x1b2   : > { %v357_v18 = vadd.f32 %v356_v16, %v313_v17  ;;  %v441_v16 = vstv %s1051_s3 }
 0x1b3   : > { %vm442_vm12 = vcmp.lt.s32.totalorder %v441_v16, %v971_v1 }
 0x1b4   : > { %699 = vtanh.f32 %v357_v18  ;;  %v579_v27 = vmul.f32 -1.442695, %v357_v18  ;;  %v450_v17 = vsel %vm442_vm12, 1, %v892_v34 }
 0x1b9   : > { %v315_v21 = vpop.f32.mrf.mxu0  ;;  %v345_v22 = vpop.f32.mrf.mxu1 }
 0x1ba   : > { %v700_v23 = vpop.eup %699  ;;  %v364_v24 = vadd.f32 %v363_v20, %v345_v22 }
 0x1bb   : > { %387 = vrot.lane.b32.xlu1 %v700_v23, %s891_s6 }
 0x1bc   : > { %701 = vtanh.f32 %v364_v24  ;;  %v580_v28 = vmul.f32 -1.442695, %v364_v24 }
 0x1bd   : > { %703 = vpow2.f32 %v579_v27 }
 0x1be   : > { %705 = vpow2.f32 %v580_v28 }
 0x1c1   : > { %v347_v25 = vpop.f32.mrf.mxu1 }
 0x1c2   : > { %v702_v26 = vpop.eup %701 }
 0x1c3   : > { %424 = vrot.lane.b32.xlu1 %v702_v26, %s891_s6  ;;  %v704_v29 = vpop.eup %703 }
 0x1c4   : > { %v368_v30 = vadd.f32 1.0, %v704_v29  ;;  %v706_v31 = vpop.eup %705 }
 0x1c5   : > { %v405_v32 = vadd.f32 1.0, %v706_v31 }
 0x1c6   : > { %707 = vrcp.f32 %v368_v30  ;;  %v380_v42 = vand.u32 2147483648, %v368_v30  ;;  %vm374_vm4 = vweird.f32 %v368_v30  ;;  %v378_v43 = vand.u32 2147483647, %v368_v30 }
 0x1c7   : > { %709 = vrcp.f32 %v405_v32  ;;  %vm411_vm7 = vweird.f32 %v405_v32  ;;  %v417_v49 = vand.u32 2147483648, %v405_v32  ;;  %v415_v52 = vand.u32 2147483647, %v405_v32 }
 0x1c8   : > { %v381_v46 = vor.u32 1.1754944e-38, %v380_v42  ;;  %vm379_vm6 = vcmp.eq.f32.partialorder %v378_v43, 8.507059e+37 }
 0x1c9   : > { %v418_v53 = vor.u32 1.1754944e-38, %v417_v49  ;;  %vm416_vm10 = vcmp.eq.f32.partialorder %v415_v52, 8.507059e+37 }
 0x1cc   : > { %v708_v33 = vpop.eup %707 }
 0x1cd   : > { %v370_v35 = vmul.f32 %v708_v33, %v368_v30  ;;  %v710_v37 = vpop.eup %709  ;;  %vm375_vm3 = vweird.f32 %v708_v33 }
 0x1ce   : > { %v407_v39 = vmul.f32 %v710_v37, %v405_v32  ;;  %vm376_vm5 = vmor %vm374_vm4, %vm375_vm3  ;;  %vm412_vm8 = vweird.f32 %v710_v37 }
 0x1cf   : > { %v371_v36 = vsub.f32 1.0, %v370_v35  ;;  %vm413_vm9 = vmor %vm411_vm7, %vm412_vm8 }
 0x1d0   : > { %v408_v41 = vsub.f32 1.0, %v407_v39 }
 0x1d1   : > { %v372_v38 = vmul.f32 %v708_v33, %v371_v36 }
 0x1d2   : > { %v409_v45 = vmul.f32 %v710_v37, %v408_v41 }
 0x1d3   : > { %v373_v40 = vadd.f32 %v708_v33, %v372_v38 }
 0x1d4   : > { %v410_v51 = vadd.f32 %v710_v37, %v409_v45 }
 0x1d5   : > { %v377_v44 = vsel %vm376_vm5, %v708_v33, %v373_v40 }
 0x1d6   : > { %v382_v48 = vsel %vm379_vm6, %v381_v46, %v377_v44  ;;  %v414_v54 = vsel %vm413_vm9, %v710_v37, %v410_v51 }
 0x1d7   : > { %v419_v56 = vsel %vm416_vm10, %v418_v53, %v414_v54  ;;  %v385_v0 = vmul.f32 %v873_v60, %v382_v48 }
 0x1d8   : > { %v422_v12 = vmul.f32 %v865_v58, %v419_v56 }
 0x22d   : > { %v388_v47 = vpop.permute.xlu1 %387 }
 0x22e   : > { %v390_v50 = vmul.f32 %v388_v47, %v382_v48 }
 0x230   : > { %392 = vrot.lane.b32.xlu2 %v390_v50, %s890_s0 }
 0x235   : > { %v425_v55 = vpop.permute.xlu1 %424 }
 0x236   : > { %v427_v57 = vmul.f32 %v425_v55, %v419_v56 }
 0x238   : > { %429 = vrot.lane.b32.xlu2 %v427_v57, %s890_s0 }
 0x240   : > { %445 = vperm.xlu2 %697, %v443_v63  }
 0x28a   : > { %v393_v3 = vpop.permute.xlu2 %392 }
 0x28b   : > { %v395_v11 = vadd.f32 %v393_v3, %v385_v0 }
 0x28d   : > { %711 = vtanh.f32 %v395_v11 }
 0x292   : > { %v430_v13 = vpop.permute.xlu2 %429 }
 0x293   : > { %v712_v14 = vpop.eup %711  ;;  %v432_v15 = vadd.f32 %v430_v13, %v422_v12 }
 0x294   : > { %398 = vrot.lane.b32.xlu0 %v712_v14, %s891_s6 }
 0x295   : > { %713 = vtanh.f32 %v432_v15 }
 0x29a   : > { %v446_v18 = vpop.permute.xlu2 %445 }
 0x29b   : > { %v714_v19 = vpop.eup %713  ;;  %vm447_vm13 = vcmp.eq.s32.totalorder %v446_v18, 1 }
 0x29c   : > { %v449_v60 = vsel %vm447_vm13, %v395_v11, %v873_v60   ;;  %452 = vperm.xlu0 %698, %v450_v17   ;;  %435 = vrot.lane.b32.xlu1 %v714_v19, %s891_s6 }
 0x306   : > { %v399_v20 = vpop.permute.xlu0 %398 }
 0x307   : > { %v401_v21 = vmul.f32 %v399_v20, %v382_v48 }
 0x309   : > { %v448_v61 = vsel %vm447_vm13, %v401_v21, %v877_v61   ;;  %v457_v22 = vsel %vm447_vm13, %v401_v21, 0.0 }
 0x30a   : > { %v458_v23 = vpack.c.bf16 %v457_v22, %v457_v22 }
 0x30c   : > { %460 = vrot.lane.b32.xlu1 %v458_v23, %s890_s0 }
 0x30e   : > { %v453_v24 = vpop.permute.xlu0 %452  ;;  %v436_v25 = vpop.permute.xlu1 %435 }
 0x30f   : > { %vm454_vm14 = vcmp.eq.s32.totalorder %v453_v24, 1  ;;  %v438_v26 = vmul.f32 %v436_v25, %v419_v56 }
 0x310   : > { %v456_v58 = vsel %vm454_vm14, %v432_v15, %v865_v58  }
 0x311   : > { %v455_v59 = vsel %vm454_vm14, %v438_v26, %v869_v59   ;;  %v467_v27 = vsel %vm454_vm14, %v438_v26, 0.0 }
 0x312   : > { %v468_v28 = vpack.c.bf16 %v467_v27, %v467_v27 }
 0x314   : > { %470 = vrot.lane.b32.xlu2 %v468_v28, %s891_s6 }
 0x36e   : > { %v471_v30 = vpop.permute.xlu2 %470 }
 0x37c   :  { %277 = sbr.rel (!%p274_p2) target bundleno = 191 (0xbf), region = 79 }
 0x37e   : > { %v461_v29 = vpop.permute.xlu1 %460 }
 0x37f   : > { %466 = vst.msk [vmem:[%s464_s29] sm:$0xf] %vm465_vm15, %v461_v29 }
 0x380   : > { %476 = vst.msk [vmem:[%s474_s30] sm:$0xf] %vm475_vm0, %v471_v30 }
 0x381 PF:  { %s483_s10 = sshll.u32 %s1101_s9, 4  ;;  %s893_s11 = smov [#allocation14]   ;;  %s484_s10 = int_to_ptr.hbm [resolvable:$true] %s483_s10 }
 0x382   :  { %s481_s13 = sshll.u32 %s893_s11, 4  ;;  %s482_s13 = int_to_ptr.vmem [resolvable:$true] %s481_s13 }
 0x383   :  { %489 = dma.vmem_to_hbm [thread:$0]  %s482_s13, 512, %s484_s10, [#allocation8], %s884_s17, %s884_s17, %s885_s18  }
 0x384   :  { %861 = dma.done.wait [#allocation8], 512  }
 0x385   :  { %862 = vsyncadd [#allocation8], 4294966784 }
 0x386   :  { %494 = vsyncpa [#allocation7], 1 }
 0x387   :  { %495 = vsyncpa [#allocation10], 1 }
 0x388   :  { %496 = vsyncpa [#allocation13], 1 }
 0x389   :  { %497 = vsyncpa [#allocation8], 1 }

</bundles_post_ra>
